<compile_context>
chip_gen: v7x
topology: tpu7x:2x2x1
jax: 0.10.0
libtpu: 0.0.40
codegen_flags: <defaults>
</compile_context>

<pallas_src>
import jax
import jax.numpy as jnp
from jax.experimental import pallas as pl
from jax.experimental.pallas import tpu as pltpu

# 32 MiB scoped-VMEM budget is comfortable on v5e/v6e (128 MiB physical) and
# on v7x (64 MiB, 2 TCs).  On v6e this can be raised to ~64 MiB with tm=1024.
_VMEM_LIMIT = 32 * 1024 * 1024

_HH = 2    # H halo on each side of the pool scratch (one 5-window reach)
_WLH = 8   # left W halo: sublane-aligned start for the interior store
_WRH = 2   # right W halo


def _hardswish(y):
    # Hardswish(x) = x * relu6(x + 3) / 6
    return y * jnp.clip(y + 3.0, 0.0, 6.0) * (1.0 / 6.0)


# ---------------------------------------------------------------------------
# Kernel 1: cv1 = 1x1 conv (channel matmul) + folded BatchNorm + Hardswish
# ---------------------------------------------------------------------------
def _conv1x1_bn_hswish_kernel(x_ref, w_ref, scale_ref, bias_ref, o_ref):
    y = jnp.dot(x_ref[...], w_ref[...], preferred_element_type=jnp.float32)
    y = y * scale_ref[...] + bias_ref[...]                  # folded BN (f32)
    o_ref[...] = _hardswish(y).astype(o_ref.dtype)


def conv1x1_bn_hswish(x_nhwc, w_bf16, scale, bias, *, out_dtype, tm=512):
    N, H, W, Cin = x_nhwc.shape
    Cout = w_bf16.shape[1]
    M = N * H * W
    tm = min(tm, M)
    x2d = x_nhwc.reshape(M, Cin)
    out = pl.pallas_call(
        _conv1x1_bn_hswish_kernel,
        grid=(pl.cdiv(M, tm),),
        out_shape=jax.ShapeDtypeStruct((M, Cout), out_dtype),
        in_specs=[
            pl.BlockSpec((tm, Cin), lambda i: (i, 0)),
            pl.BlockSpec((Cin, Cout), lambda i: (0, 0)),
            pl.BlockSpec((1, Cout), lambda i: (0, 0)),
            pl.BlockSpec((1, Cout), lambda i: (0, 0)),
        ],
        out_specs=pl.BlockSpec((tm, Cout), lambda i: (i, 0)),
        compiler_params=pltpu.CompilerParams(
            dimension_semantics=("parallel",),
            vmem_limit_bytes=_VMEM_LIMIT),
    )(x2d, w_bf16,
      scale.reshape(1, Cout).astype(jnp.float32),
      bias.reshape(1, Cout).astype(jnp.float32))
    return out.reshape(N, H, W, Cout)


# ---------------------------------------------------------------------------
# Kernel 2: fused SPPF pools + channel concat + cv2 + folded BN + Hardswish
#   out = hardswish(BN( y@W2_0 + pool5(y)@W2_1 + pool9(y)@W2_2 + pool13(y)@W2_3 ))
# Grid: (batch, c_-channel tiles); channel-tile axis is the matmul reduction
# into a resident f32 accumulator (init / finalize via pl.when).
# ---------------------------------------------------------------------------
def _sppf_concat_cv2_kernel(y_ref, w_ref, scale_ref, bias_ref, o_ref,
                            pad_ref, acc_ref):
    c = pl.program_id(1)
    H, W, TC = y_ref.shape
    L = H * W

    @pl.when(c == 0)
    def _():
        acc_ref[...] = jnp.zeros_like(acc_ref)
        # -inf halo scratch; pool stages overwrite only the interior, so the
        # halo rows/columns stay -inf and one fill per batch item suffices.
        pad_ref[...] = jnp.full(pad_ref.shape, -jnp.inf, dtype=pad_ref.dtype)

    def pool5_same(v):
        # MaxPool2d(k=5, stride=1, pad=2) with -inf padding, same-size output.
        # Runs in the input dtype (bf16): max is exact; half the VMEM traffic.
        pad_ref[_HH:_HH + H, _WLH:_WLH + W, :] = v
        q = pad_ref[...]                                # (H+4, W+_WLH+_WRH, TC)
        # H (row) pass along the free leading axis — log-step: 3 maxes not 4.
        t2 = jnp.maximum(q[0:H + 3], q[1:H + 4])        # max over {i, i+1}
        t4 = jnp.maximum(t2[0:H + 1], t2[2:H + 3])      # max over {i..i+3}
        r = jnp.maximum(t4[0:H], q[4:H + 4])            # max over {i..i+4}
        # W (column) pass — output col j covers padded cols [_WLH-2+j, _WLH+2+j].
        s = _WLH - 2
        u2 = jnp.maximum(r[:, s:s + W + 2], r[:, s + 1:s + W + 3])
        u4 = jnp.maximum(u2[:, 0:W], u2[:, 2:W + 2])
        return jnp.maximum(u4, r[:, s + 4:s + 4 + W])   # (H, W, TC)

    y = y_ref[...]                                      # bf16 (H, W, TC)
    p5 = pool5_same(y)                                  # == maxpool k=5
    p9 = pool5_same(p5)                                 # == maxpool k=9
    p13 = pool5_same(p9)                                # == maxpool k=13

    # Concat-free cv2: w2 is split row-wise into 4 per-branch blocks and the
    # channel-tile axis is the contraction, accumulated in f32 on the MXU.
    # NOTE: the (H, W, TC) -> (H*W, TC) flatten is layout-free when W is a
    # multiple of the sublane tile (8 for f32 / 16 for bf16).
    acc = acc_ref[...]
    acc = acc + jnp.dot(y.reshape(L, TC), w_ref[0],
                        preferred_element_type=jnp.float32)
    acc = acc + jnp.dot(p5.reshape(L, TC), w_ref[1],
                        preferred_element_type=jnp.float32)
    acc = acc + jnp.dot(p9.reshape(L, TC), w_ref[2],
                        preferred_element_type=jnp.float32)
    acc = acc + jnp.dot(p13.reshape(L, TC), w_ref[3],
                        preferred_element_type=jnp.float32)
    acc_ref[...] = acc

    @pl.when(c == pl.num_programs(1) - 1)
    def _():
        z = acc_ref[...] * scale_ref[...] + bias_ref[...]   # folded BN (f32)
        o_ref[...] = _hardswish(z).astype(o_ref.dtype)


def sppf_concat_cv2(y_nhwc, w_stack_bf16, scale, bias, *, out_dtype, tc=128):
    N, H, W, C = y_nhwc.shape
    Cout = w_stack_bf16.shape[-1]
    L = H * W
    # The channel-tile axis is a matmul reduction, so tc must divide C exactly
    # (a partial out-of-bounds tile would feed garbage into the contraction).
    tc = min(tc, C)
    if C % tc:
        tc = C
    # v7x note: choose tc so N * (C // tc) is >= 2 / even, keeping both
    # TensorCores busy on the "parallel" batch axis.
    w_pad = W + _WLH + _WRH
    out = pl.pallas_call(
        _sppf_concat_cv2_kernel,
        out_shape=jax.ShapeDtypeStruct((N, L, Cout), out_dtype),
        grid_spec=pltpu.PrefetchScalarGridSpec(
            num_scalar_prefetch=0,
            grid=(N, C // tc),
            in_specs=[
                pl.BlockSpec((None, H, W, tc), lambda n, c: (n, 0, 0, c)),
                pl.BlockSpec((4, tc, Cout), lambda n, c: (0, c, 0)),
                pl.BlockSpec((1, Cout), lambda n, c: (0, 0)),
                pl.BlockSpec((1, Cout), lambda n, c: (0, 0)),
            ],
            out_specs=pl.BlockSpec((None, L, Cout), lambda n, c: (n, 0, 0)),
            scratch_shapes=[
                pltpu.VMEM((H + 2 * _HH, w_pad, tc), y_nhwc.dtype),  # -inf halo
                pltpu.VMEM((L, Cout), jnp.float32),                  # accumulator
            ]),
        compiler_params=pltpu.CompilerParams(
            dimension_semantics=("parallel", "arbitrary"),
            vmem_limit_bytes=_VMEM_LIMIT),
    )(y_nhwc, w_stack_bf16,
      scale.reshape(1, Cout).astype(jnp.float32),
      bias.reshape(1, Cout).astype(jnp.float32))
    return out


# ---------------------------------------------------------------------------
# SPP forward (wrapper).  NCHW in / NCHW out, like the PyTorch module.
# ---------------------------------------------------------------------------
def spp_forward(x_nchw, params, *, k=(5, 9, 13), tm=512, tc=128):
    # The fused pool chain relies on the SPPF identity, valid only for
    # k=(5, 9, 13) with stride 1 and k//2 padding.
    assert tuple(k) == (5, 9, 13), "fused SPPF pooling requires k=(5, 9, 13)"
    N, Cin, H, W = x_nchw.shape

    w1 = params["w1"].astype(jnp.bfloat16)                  # (Cin, c_)
    c_ = w1.shape[1]
    w2 = params["w2"]                                       # (4*c_, Cout)
    cout = w2.shape[1]
    w2s = w2.reshape(4, c_, cout).astype(jnp.bfloat16)      # per-branch split

    # NCHW -> NHWC; the bf16 cast rides the same transpose pass, halving
    # cv1's HBM input read.
    x = jnp.transpose(x_nchw, (0, 2, 3, 1)).astype(jnp.bfloat16)
    y = conv1x1_bn_hswish(x, w1, params["scale1"], params["bias1"],
                          out_dtype=jnp.bfloat16, tm=tm)    # (N, H, W, c_)
    z = sppf_concat_cv2(y, w2s, params["scale2"], params["bias2"],
                        out_dtype=x_nchw.dtype, tc=tc)      # (N, H*W, Cout)
    z = z.reshape(N, H, W, cout)
    # TODO(synk): optionally emit NCHW directly from the cv2 kernel (XLU
    # transpose of the (H*W, Cout) tile) to drop this final XLA transpose.
    return jnp.transpose(z, (0, 3, 1, 2))                   # NHWC -> NCHW


# ---------------------------------------------------------------------------
# Deterministic synthetic parameters (Conv2d has no bias; BN folded, eval mode)
# ---------------------------------------------------------------------------
def make_params(key, in_channels, out_channels, k=(5, 9, 13), eps=1e-5):
    c_ = in_channels // 2
    c_cat = c_ * (len(k) + 1)

    def conv_bn(key, cin, cout):
        k1, k2, k3, k4, k5 = jax.random.split(key, 5)
        w = 0.1 * jax.random.normal(k1, (cin, cout), jnp.float32)
        gamma = 1.0 + 0.1 * jax.random.normal(k2, (cout,), jnp.float32)
        beta = 0.05 * jax.random.normal(k3, (cout,), jnp.float32)
        run_mean = 0.05 * jax.random.normal(k4, (cout,), jnp.float32)
        run_var = jnp.abs(jax.random.normal(k5, (cout,), jnp.float32)) + 0.5
        scale = gamma / jnp.sqrt(run_var + eps)
        bias = beta - run_mean * scale
        return w, scale, bias

    kA, kB = jax.random.split(key)
    w1, s1, b1 = conv_bn(kA, in_channels, c_)
    w2, s2, b2 = conv_bn(kB, c_cat, out_channels)
    return dict(w1=w1, scale1=s1, bias1=b1, w2=w2, scale2=s2, bias2=b2)


# ---------------------------------------------------------------------------
# Pure-JAX f32 reference (correctness check only)
# ---------------------------------------------------------------------------
def spp_reference(x_nchw, params, k=(5, 9, 13)):
    def conv_bn_act(x, w, scale, bias):
        y = jnp.einsum("nchw,co->nohw", x, w)
        y = y * scale[None, :, None, None] + bias[None, :, None, None]
        return y * jnp.clip(y + 3.0, 0.0, 6.0) / 6.0

    def maxpool(x, kk):
        p = kk // 2
        return jax.lax.reduce_window(
            x, -jnp.inf, jax.lax.max,
            window_dimensions=(1, 1, kk, kk),
            window_strides=(1, 1, 1, 1),
            padding=((0, 0), (0, 0), (p, p), (p, p)))

    y = conv_bn_act(x_nchw, params["w1"], params["scale1"], params["bias1"])
    cat = jnp.concatenate([y] + [maxpool(y, kk) for kk in k], axis=1)
    return conv_bn_act(cat, params["w2"], params["scale2"], params["bias2"])


if __name__ == "__main__":
    key = jax.random.PRNGKey(0)
    k_x, k_p = jax.random.split(key)

    N, Cin, H, W = 2, 4, 16, 16
    Cout = 8
    x = jax.random.normal(k_x, (N, Cin, H, W), jnp.float32)  # NCHW like PyTorch
    params = make_params(k_p, Cin, Cout)

    # Small row tile at toy sizes so the tiled/pipelined path is exercised
    # (production sizes would use tm=512..1024, tc=128).
    out = jax.block_until_ready(spp_forward(x, params, tm=128, tc=128))
    assert out.shape == (N, Cout, H, W), out.shape

    ref = spp_reference(x, params)
    err = float(jnp.max(jnp.abs(out - ref)))
    # bf16 matmul inputs / bf16 activation storage -> small rounding vs f32 ref.
    assert jnp.allclose(out, ref, rtol=2e-2, atol=2e-2), err

    print("KERNEL_OK")
</pallas_src>

<mosaic_0001>
module attributes {stable_mosaic.version = 11 : i64} {
  func.func @_conv1x1_bn_hswish_kernel(%arg0: i32, %arg1: memref<128x4xbf16, #tpu.memory_space<vmem>>, %arg2: memref<4x2xbf16, #tpu.memory_space<vmem>>, %arg3: memref<1x2xf32, #tpu.memory_space<vmem>>, %arg4: memref<1x2xf32, #tpu.memory_space<vmem>>, %arg5: memref<128x2xbf16, #tpu.memory_space<vmem>>) attributes {dimension_semantics = [#tpu.dimension_semantics<parallel>], iteration_bounds = array<i64: 4>, scalar_prefetch = 0 : i64, scratch_operands = 0 : i64, tpu.core_type = #tpu.core_type<tc>, window_params = [{transform_indices = @transform_0, window_bounds = array<i64: 128, 4>}, {pipeline_mode = #tpu.pipeline_mode<synchronous>, transform_indices = @transform_1, window_bounds = array<i64: 4, 2>}, {pipeline_mode = #tpu.pipeline_mode<synchronous>, transform_indices = @transform_2, window_bounds = array<i64: 1, 2>}, {pipeline_mode = #tpu.pipeline_mode<synchronous>, transform_indices = @transform_3, window_bounds = array<i64: 1, 2>}, {transform_indices = @transform_4, window_bounds = array<i64: 128, 2>}]} {
    %c0 = arith.constant 0 : index
    %c0_0 = arith.constant 0 : index
    %0 = vector.load %arg1[%c0, %c0_0] : memref<128x4xbf16, #tpu.memory_space<vmem>>, vector<128x4xbf16>
    %c0_1 = arith.constant 0 : index
    %c0_2 = arith.constant 0 : index
    %1 = vector.load %arg2[%c0_1, %c0_2] : memref<4x2xbf16, #tpu.memory_space<vmem>>, vector<4x2xbf16>
    %cst = arith.constant dense<0.000000e+00> : vector<128x2xf32>
    %2 = tpu.matmul %0, %1, %cst {dimension_numbers = #tpu.dot_dimension_numbers<[1], [0], [0], [1], [0, 0, 1, 1], [], []>} : vector<128x4xbf16>, vector<4x2xbf16>, vector<128x2xf32> -> vector<128x2xf32>
    %c0_3 = arith.constant 0 : index
    %c0_4 = arith.constant 0 : index
    %3 = vector.load %arg3[%c0_3, %c0_4] : memref<1x2xf32, #tpu.memory_space<vmem>>, vector<1x2xf32>
    %4 = vector.broadcast %3 : vector<1x2xf32> to vector<128x2xf32>
    %5 = arith.mulf %2, %4 : vector<128x2xf32>
    %c0_5 = arith.constant 0 : index
    %c0_6 = arith.constant 0 : index
    %6 = vector.load %arg4[%c0_5, %c0_6] : memref<1x2xf32, #tpu.memory_space<vmem>>, vector<1x2xf32>
    %7 = vector.broadcast %6 : vector<1x2xf32> to vector<128x2xf32>
    %8 = arith.addf %5, %7 : vector<128x2xf32>
    %cst_7 = arith.constant 3.000000e+00 : f32
    %9 = vector.broadcast %cst_7 : f32 to vector<128x2xf32>
    %10 = arith.addf %8, %9 : vector<128x2xf32>
    %cst_8 = arith.constant 0.000000e+00 : f32
    %cst_9 = arith.constant 6.000000e+00 : f32
    %11 = vector.broadcast %cst_8 : f32 to vector<128x2xf32>
    %12 = arith.maximumf %11, %10 : vector<128x2xf32>
    %13 = vector.broadcast %cst_9 : f32 to vector<128x2xf32>
    %14 = arith.minimumf %13, %12 : vector<128x2xf32>
    %15 = arith.mulf %8, %14 : vector<128x2xf32>
    %cst_10 = arith.constant 0.166666672 : f32
    %16 = vector.broadcast %cst_10 : f32 to vector<128x2xf32>
    %17 = arith.mulf %15, %16 : vector<128x2xf32>
    %18 = arith.truncf %17 : vector<128x2xf32> to vector<128x2xbf16>
    %c0_11 = arith.constant 0 : index
    %c0_12 = arith.constant 0 : index
    %19 = vector.load %arg5[%c0_11, %c0_12] : memref<128x2xbf16, #tpu.memory_space<vmem>>, vector<128x2xbf16>
    tpu.vector_store %arg5[%c0_11, %c0_12], %18 {strides = array<i32>} : memref<128x2xbf16, #tpu.memory_space<vmem>>, vector<128x2xbf16>,
    return
  }
  func.func @transform_0(%arg0: i32) -> (i32, i32) {
    %c0_i32 = arith.constant 0 : i32
    %c0_i32_0 = arith.constant 0 : i32
    return %arg0, %c0_i32 : i32, i32
  }
  func.func @transform_1(%arg0: i32) -> (i32, i32) {
    %c0_i32 = arith.constant 0 : i32
    %c0_i32_0 = arith.constant 0 : i32
    %c0_i32_1 = arith.constant 0 : i32
    return %c0_i32, %c0_i32_0 : i32, i32
  }
  func.func @transform_2(%arg0: i32) -> (i32, i32) {
    %c0_i32 = arith.constant 0 : i32
    %c0_i32_0 = arith.constant 0 : i32
    %c0_i32_1 = arith.constant 0 : i32
    return %c0_i32, %c0_i32_0 : i32, i32
  }
  func.func @transform_3(%arg0: i32) -> (i32, i32) {
    %c0_i32 = arith.constant 0 : i32
    %c0_i32_0 = arith.constant 0 : i32
    %c0_i32_1 = arith.constant 0 : i32
    return %c0_i32, %c0_i32_0 : i32, i32
  }
  func.func @transform_4(%arg0: i32) -> (i32, i32) {
    %c0_i32 = arith.constant 0 : i32
    %c0_i32_0 = arith.constant 0 : i32
    return %arg0, %c0_i32 : i32, i32
  }
}

</mosaic_0001>

<bundles_post_ra>
// kernel: tpu_custom_call.1
= control target key start
LH: loop header
LB: loop body
LE: loop exit
PB: predicated region body
PF: predicated region fallthrough
CT: control target
= control target key end

     0   :  { %s789_s15 = smov 0   ;;  %s900_s0 = inlined_call_operand.vmem [shape: bf16[512,4], index: 0, kind: input, shape index: {}]   ;;  %s901_s1 = inlined_call_operand.vmem [shape: bf16[4,2], index: 1, kind: input, shape index: {}]   ;;  %s902_s2 = inlined_call_operand.vmem [shape: f32[1,2], index: 2, kind: input, shape index: {}]   ;;  %s903_s3 = inlined_call_operand.vmem [shape: f32[1,2], index: 3, kind: input, shape index: {}]   ;;  %s904_s4 = inlined_call_operand.vmem [shape: bf16[512,2], index: 4, kind: output, shape index: {}]  }
   0x1 LB: > { %s648_s16 = sadd.s32 4294967295, %s762_s15   ;;  %p652_p0 = scmp.ge.s32.totalorder %s762_s15, 1  ;;  %s762_s15 = sphi %s789_s15, %s14_s15  }
   0x2   : > { %p163_p1 = scmp.lt.s32.totalorder %s762_s15, 5 }
   0x4   : > { %p164_p2 = pnand %p652_p0, %p163_p1 }
   0x5   : > { %v218_v0 = vld [vmem:[%s901_s1] sm:$0x3] (!%p164_p2)  ;;  %vm284_vm0 = vcmask (!%p164_p2), 1041408   ;;  %s653_s19 = sshll.u32 (!%p164_p2), %s648_s16, 4  ;;  %vm259_vm1 = vcmask (!%p164_p2), 31744   ;;  %vm575_vm2 = vcmask (!%p164_p2), 11264  }
   0x6   : > { %167 = sbr.rel (%p164_p2) target bundleno = 268 (0x10c), region = 36  ;;  %738 = vmatprep.subr.msk.bf16.mxu0 (!%p164_p2), %vm284_vm0, %v218_v0  ;;  %739 = vmatprep.subr.msk.bf16.mxu1 (!%p164_p2), %vm284_vm0, %v218_v0  ;;  %v286_v1 = vsel (!%p164_p2), %vm284_vm0, %v218_v0, 0  ;;  %p190_p3 = scmp.lt.s32.totalorder (!%p164_p2), %s653_s19, 63  ;;  %v819_v10 = vld [vmem:[%s902_s2] ss:$0 sm:$0xff] (!%p164_p2) }
   0x7   : > { %719 = vmatpush3.bf16.msra.mxu0 (!%p164_p2), %v286_v1  ;;  %737 = vmatpush3.bf16.msra.mxu1 (!%p164_p2), %v286_v1  ;;  %v824_v12 = vld [vmem:[%s903_s3] ss:$0 sm:$0xff] (!%p164_p2) }
   0xd   : > { %s906_s19 = smov (!%p190_p3, %s653_s19), 63 }
   0xe   : > { %s654_s20 = sshll.u32 %s906_s19, 2 }
   0xf   : > { %s193_s23 = scalar_lea.vmem %s900_s0, %s654_s20  ;;  %s847_s30 = scalar_lea.vmem %s904_s4, %s654_s20 }
  0x10   : > { %v748_v2 = vld [vmem:[%s193_s23] sm:$0xff]   ;;  %v750_v4 = vld [vmem:[%s193_s23 + $0x8] sm:$0xff]   ;;  %v752_v6 = vld [vmem:[%s193_s23 + $0x10] sm:$0xff]  }
  0x11   : > { %v749_v3 = vld [vmem:[%s193_s23 + $0x20] sm:$0xff]   ;;  %720 = vmatprep.mubr.msk.bf16.mxu0 %vm259_vm1, %v748_v2  ;;  %v751_v5 = vld [vmem:[%s193_s23 + $0x28] sm:$0xff]   ;;  %v753_v7 = vld [vmem:[%s193_s23 + $0x30] sm:$0xff]  }
  0x12   : > { %728 = vmatprep.mubr.msk.bf16.mxu1 %vm259_vm1, %v749_v3  ;;  %721 = vmatmul.mubr.msk.bf16.vlgmr.msra.gmra.mrb[0].mxu0 %vm259_vm1, %v750_v4  ;;  %v754_v8 = vld [vmem:[%s193_s23 + $0x18] sm:$0xff]  }
  0x13   : > { %729 = vmatmul.mubr.msk.bf16.vlgmr.msra.gmra.mrb[0].mxu1 %vm259_vm1, %v751_v5  ;;  %724 = vmatprep.mubr.msk.bf16.mxu0 %vm259_vm1, %v752_v6  ;;  %v755_v9 = vld [vmem:[%s193_s23 + $0x38] sm:$0xff]  }
  0x14   : > { %732 = vmatprep.mubr.msk.bf16.mxu1 %vm259_vm1, %v753_v7 }
  0x1a   : > { %725 = vmatmul.mubr.msk.bf16.gmra.mrb[4].mxu0 %vm259_vm1, %v754_v8 }
  0x1b   : > { %733 = vmatmul.mubr.msk.bf16.gmra.mrb[4].mxu1 %vm259_vm1, %v755_v9 }
  0xe5   : > { %v722_v11 = vpop.f32.mrb[0].mxu0 }
  0xe6   : > { %v394_v13 = vmul.f32 %v722_v11, %v819_v10  ;;  %v730_v14 = vpop.f32.mrb[0].mxu1  ;;  %v322_v15 = vpop.f32.mrb[1].mxu0 }
  0xe7   : > { %v402_v16 = vmul.f32 %v730_v14, %v819_v10  ;;  %v392_v17 = vmul.f32 %v819_v10, %v322_v15  ;;  %v354_v18 = vpop.f32.mrb[1].mxu1  ;;  %v723_v19 = vpop.f32.mrb[2].mxu0 }
  0xe8   : > { %v417_v20 = vadd.f32 %v824_v12, %v394_v13  ;;  %v400_v21 = vmul.f32 %v819_v10, %v354_v18  ;;  %v395_v22 = vmul.f32 %v723_v19, %v819_v10  ;;  %v731_v23 = vpop.f32.mrb[2].mxu1  ;;  %v325_v24 = vpop.f32.mrb[3].mxu0 }
  0xe9   : > { %v425_v25 = vadd.f32 %v824_v12, %v402_v16  ;;  %v415_v26 = vadd.f32 %v824_v12, %v392_v17  ;;  %v403_v27 = vmul.f32 %v731_v23, %v819_v10  ;;  %v393_v28 = vmul.f32 %v819_v10, %v325_v24  ;;  %v357_v29 = vpop.f32.mrb[3].mxu1 }
  0xea   : > { %v433_v30 = vadd.f32 3.0, %v417_v20  ;;  %v423_v31 = vadd.f32 %v824_v12, %v400_v21  ;;  %v418_v32 = vadd.f32 %v824_v12, %v395_v22  ;;  %v401_v33 = vmul.f32 %v819_v10, %v357_v29 }
  0xeb   : > { %v441_v34 = vadd.f32 3.0, %v425_v25  ;;  %v431_v35 = vadd.f32 3.0, %v415_v26  ;;  %v426_v36 = vadd.f32 %v824_v12, %v403_v27  ;;  %v416_v37 = vadd.f32 %v824_v12, %v393_v28 }
  0xec   : > { %v449_v38 = vmax.f32 %v433_v30, 0.0  ;;  %v439_v39 = vadd.f32 3.0, %v423_v31  ;;  %v434_v40 = vadd.f32 3.0, %v418_v32  ;;  %v424_v41 = vadd.f32 %v824_v12, %v401_v33 }
  0xed   : > { %v457_v42 = vmax.f32 %v441_v34, 0.0  ;;  %v447_v43 = vmax.f32 %v431_v35, 0.0  ;;  %v442_v44 = vadd.f32 3.0, %v426_v36  ;;  %v432_v45 = vadd.f32 3.0, %v416_v37  ;;  %v726_v46 = vpop.f32.mrb[4].mxu0 }
  0xee   : > { %v465_v47 = vmin.f32 %v449_v38, 6.0  ;;  %v455_v48 = vmax.f32 %v439_v39, 0.0  ;;  %v450_v49 = vmax.f32 %v434_v40, 0.0  ;;  %v440_v50 = vadd.f32 3.0, %v424_v41  ;;  %v734_v51 = vpop.f32.mrb[4].mxu1  ;;  %v338_v52 = vpop.f32.mrb[5].mxu0 }
  0xef   : > { %v473_v53 = vmin.f32 %v457_v42, 6.0  ;;  %v463_v54 = vmin.f32 %v447_v43, 6.0  ;;  %v458_v55 = vmax.f32 %v442_v44, 0.0  ;;  %v448_v56 = vmax.f32 %v432_v45, 0.0  ;;  %v370_v57 = vpop.f32.mrb[5].mxu1  ;;  %v727_v58 = vpop.f32.mrb[6].mxu0 }
  0xf0   : > { %v481_v59 = vmul.f32 %v465_v47, %v417_v20  ;;  %v471_v60 = vmin.f32 %v455_v48, 6.0  ;;  %v466_v61 = vmin.f32 %v450_v49, 6.0  ;;  %v456_v62 = vmax.f32 %v440_v50, 0.0  ;;  %v735_v63 = vpop.f32.mrb[6].mxu1  ;;  %v341_v0 = vpop.f32.mrb[7].mxu0 }
  0xf1   : > { %v489_v1 = vmul.f32 %v473_v53, %v425_v25  ;;  %v479_v2 = vmul.f32 %v463_v54, %v415_v26  ;;  %v474_v3 = vmin.f32 %v458_v55, 6.0  ;;  %v464_v4 = vmin.f32 %v448_v56, 6.0  ;;  %v373_v5 = vpop.f32.mrb[7].mxu1 }
  0xf2   : > { %v497_v6 = vmul.f32 0.16666667, %v481_v59  ;;  %v487_v7 = vmul.f32 %v471_v60, %v423_v31  ;;  %v482_v8 = vmul.f32 %v466_v61, %v418_v32  ;;  %v472_v9 = vmin.f32 %v456_v62, 6.0 }
  0xf3   : > { %v505_v11 = vmul.f32 0.16666667, %v489_v1  ;;  %v495_v13 = vmul.f32 0.16666667, %v479_v2  ;;  %v490_v14 = vmul.f32 %v474_v3, %v426_v36  ;;  %v480_v15 = vmul.f32 %v464_v4, %v416_v37 }
  0xf4   : > { %v695_v16 = vpack.c.bf16 %v497_v6, %v497_v6  ;;  %v503_v17 = vmul.f32 0.16666667, %v487_v7  ;;  %v498_v18 = vmul.f32 0.16666667, %v482_v8  ;;  %v488_v19 = vmul.f32 %v472_v9, %v424_v41 }
  0xf5   : > { %v703_v20 = vpack.c.bf16 %v505_v11, %v505_v11  ;;  %v693_v21 = vpack.c.bf16 %v495_v13, %v495_v13  ;;  %v506_v22 = vmul.f32 0.16666667, %v490_v14  ;;  %v496_v23 = vmul.f32 0.16666667, %v480_v15 }
  0xf6   : > { %578 = vst.msk [vmem:[%s847_s30 + $0x8] sm:$0xf] %vm575_vm2, %v695_v16  ;;  %v701_v24 = vpack.c.bf16 %v503_v17, %v503_v17  ;;  %v696_v25 = vpack.c.bf16 %v498_v18, %v498_v18  ;;  %v504_v26 = vmul.f32 0.16666667, %v488_v19  ;;  %v398_v27 = vmul.f32 %v726_v46, %v819_v10 }
  0xf7   : > { %586 = vst.msk [vmem:[%s847_s30 + $0x28] sm:$0xf] %vm575_vm2, %v703_v20  ;;  %576 = vst.msk [vmem:[%s847_s30] sm:$0xf] %vm575_vm2, %v693_v21  ;;  %v704_v28 = vpack.c.bf16 %v506_v22, %v506_v22  ;;  %v694_v29 = vpack.c.bf16 %v496_v23, %v496_v23  ;;  %v406_v30 = vmul.f32 %v734_v51, %v819_v10 }
  0xf8   : > { %v396_v31 = vmul.f32 %v819_v10, %v338_v52  ;;  %584 = vst.msk [vmem:[%s847_s30 + $0x20] sm:$0xf] %vm575_vm2, %v701_v24  ;;  %579 = vst.msk [vmem:[%s847_s30 + $0xc] sm:$0xf] %vm575_vm2, %v696_v25  ;;  %v702_v32 = vpack.c.bf16 %v504_v26, %v504_v26  ;;  %v421_v33 = vadd.f32 %v824_v12, %v398_v27 }
  0xf9   : > { %v404_v34 = vmul.f32 %v819_v10, %v370_v57  ;;  %v399_v35 = vmul.f32 %v727_v58, %v819_v10  ;;  %587 = vst.msk [vmem:[%s847_s30 + $0x2c] sm:$0xf] %vm575_vm2, %v704_v28  ;;  %577 = vst.msk [vmem:[%s847_s30 + $0x4] sm:$0xf] %vm575_vm2, %v694_v29  ;;  %v429_v36 = vadd.f32 %v824_v12, %v406_v30 }
  0xfa   : > { %v419_v37 = vadd.f32 %v824_v12, %v396_v31  ;;  %v407_v38 = vmul.f32 %v735_v63, %v819_v10  ;;  %v397_v39 = vmul.f32 %v819_v10, %v341_v0  ;;  %585 = vst.msk [vmem:[%s847_s30 + $0x24] sm:$0xf] %vm575_vm2, %v702_v32  ;;  %v437_v40 = vadd.f32 3.0, %v421_v33 }
  0xfb   : > { %v427_v41 = vadd.f32 %v824_v12, %v404_v34  ;;  %v422_v42 = vadd.f32 %v824_v12, %v399_v35  ;;  %v405_v43 = vmul.f32 %v819_v10, %v373_v5  ;;  %v445_v44 = vadd.f32 3.0, %v429_v36 }
  0xfc   : > { %v435_v45 = vadd.f32 3.0, %v419_v37  ;;  %v430_v46 = vadd.f32 %v824_v12, %v407_v38  ;;  %v420_v47 = vadd.f32 %v824_v12, %v397_v39  ;;  %v453_v48 = vmax.f32 %v437_v40, 0.0 }
  0xfd   : > { %v443_v49 = vadd.f32 3.0, %v427_v41  ;;  %v438_v50 = vadd.f32 3.0, %v422_v42  ;;  %v428_v51 = vadd.f32 %v824_v12, %v405_v43  ;;  %v461_v52 = vmax.f32 %v445_v44, 0.0 }
  0xfe   : > { %v451_v53 = vmax.f32 %v435_v45, 0.0  ;;  %v446_v54 = vadd.f32 3.0, %v430_v46  ;;  %v436_v55 = vadd.f32 3.0, %v420_v47  ;;  %v469_v56 = vmin.f32 %v453_v48, 6.0 }
  0xff   : > { %v459_v57 = vmax.f32 %v443_v49, 0.0  ;;  %v454_v58 = vmax.f32 %v438_v50, 0.0  ;;  %v444_v59 = vadd.f32 3.0, %v428_v51  ;;  %v477_v10 = vmin.f32 %v461_v52, 6.0 }
 0x100   : > { %v467_v60 = vmin.f32 %v451_v53, 6.0  ;;  %v462_v61 = vmax.f32 %v446_v54, 0.0  ;;  %v452_v62 = vmax.f32 %v436_v55, 0.0  ;;  %v485_v63 = vmul.f32 %v469_v56, %v421_v33 }
 0x101   : > { %v475_v0 = vmin.f32 %v459_v57, 6.0  ;;  %v470_v1 = vmin.f32 %v454_v58, 6.0  ;;  %v460_v2 = vmax.f32 %v444_v59, 0.0  ;;  %v493_v3 = vmul.f32 %v477_v10, %v429_v36 }
 0x102   : > { %v483_v4 = vmul.f32 %v467_v60, %v419_v37  ;;  %v478_v5 = vmin.f32 %v462_v61, 6.0  ;;  %v468_v12 = vmin.f32 %v452_v62, 6.0  ;;  %v501_v6 = vmul.f32 0.16666667, %v485_v63 }
 0x103   : > { %v491_v7 = vmul.f32 %v475_v0, %v427_v41  ;;  %v486_v8 = vmul.f32 %v470_v1, %v422_v42  ;;  %v476_v9 = vmin.f32 %v460_v2, 6.0  ;;  %v509_v11 = vmul.f32 0.16666667, %v493_v3 }
 0x104   : > { %v499_v13 = vmul.f32 0.16666667, %v483_v4  ;;  %v494_v14 = vmul.f32 %v478_v5, %v430_v46  ;;  %v484_v15 = vmul.f32 %v468_v12, %v420_v47  ;;  %v699_v16 = vpack.c.bf16 %v501_v6, %v501_v6 }
 0x105   : > { %v507_v17 = vmul.f32 0.16666667, %v491_v7  ;;  %v502_v18 = vmul.f32 0.16666667, %v486_v8  ;;  %v492_v19 = vmul.f32 %v476_v9, %v428_v51  ;;  %v707_v20 = vpack.c.bf16 %v509_v11, %v509_v11 }
 0x106   : > { %v697_v21 = vpack.c.bf16 %v499_v13, %v499_v13  ;;  %v510_v22 = vmul.f32 0.16666667, %v494_v14  ;;  %v500_v23 = vmul.f32 0.16666667, %v484_v15  ;;  %582 = vst.msk [vmem:[%s847_s30 + $0x18] sm:$0xf] %vm575_vm2, %v699_v16 }
 0x107   : > { %v705_v24 = vpack.c.bf16 %v507_v17, %v507_v17  ;;  %v700_v25 = vpack.c.bf16 %v502_v18, %v502_v18  ;;  %v508_v26 = vmul.f32 0.16666667, %v492_v19  ;;  %590 = vst.msk [vmem:[%s847_s30 + $0x38] sm:$0xf] %vm575_vm2, %v707_v20 }
 0x108   : > { %580 = vst.msk [vmem:[%s847_s30 + $0x10] sm:$0xf] %vm575_vm2, %v697_v21  ;;  %v708_v27 = vpack.c.bf16 %v510_v22, %v510_v22  ;;  %v698_v28 = vpack.c.bf16 %v500_v23, %v500_v23 }
 0x109   : > { %588 = vst.msk [vmem:[%s847_s30 + $0x30] sm:$0xf] %vm575_vm2, %v705_v24  ;;  %583 = vst.msk [vmem:[%s847_s30 + $0x1c] sm:$0xf] %vm575_vm2, %v700_v25  ;;  %v706_v29 = vpack.c.bf16 %v508_v26, %v508_v26 }
 0x10a   : > { %591 = vst.msk [vmem:[%s847_s30 + $0x3c] sm:$0xf] %vm575_vm2, %v708_v27  ;;  %581 = vst.msk [vmem:[%s847_s30 + $0x14] sm:$0xf] %vm575_vm2, %v698_v28 }
 0x10b   : > { %589 = vst.msk [vmem:[%s847_s30 + $0x34] sm:$0xf] %vm575_vm2, %v706_v29 }
 0x10c PF: > { %s14_s15 = sadd.s32 1, %s762_s15  }
 0x10d   : > { %p11_p4 = scmp.ge.s32.totalorder %s14_s15, 6  }
 0x10f   :  { %13 = sbr.rel (!%p11_p4) target bundleno = 1 (0x1), region = 66 }

</bundles_post_ra>
